<compile_context>
chip_gen: v7x
topology: tpu7x:2x2x1
jax: 0.10.0
libtpu: 0.0.40
codegen_flags: <defaults>
</compile_context>

<pallas_src>
import functools
import math

import jax
import jax.numpy as jnp
from jax import lax
from jax.experimental import pallas as pl
from jax.experimental.pallas import tpu as pltpu

LANE = 128      # pad all feature axes to the vreg lane width
SUBLANE = 8     # pad the sequence axis to a sublane multiple


def _transformer_kernel(d_model, seq_len, num_classes, di_pad,
                        idx_ref, emb_ref, pos_ref, wqkv_ref,
                        wlin_t_ref, blin_ref, wout_t_ref, bout_ref,
                        logp_ref, attn_ref):
    s_pad = pos_ref.shape[0]
    v_pad = emb_ref.shape[0]

    # ---- Embedding gather fused as a one-hot matmul (MXU-friendly). ----
    idx = idx_ref[...]                                              # [S_pad, 1] int32
    vocab_iota = lax.broadcasted_iota(jnp.int32, (s_pad, v_pad), 1)
    onehot = (vocab_iota == idx).astype(jnp.float32)                # [S_pad, V_pad]
    x = jnp.dot(onehot, emb_ref[...],
                preferred_element_type=jnp.float32) + pos_ref[...]  # [S_pad, D_pad]

    # ---- Fused Q/K/V: single matmul against the packed [D_pad, 3*Di_pad] weight. ----
    qkv = jnp.dot(x, wqkv_ref[...], preferred_element_type=jnp.float32)
    q = qkv[:, 0 * di_pad:1 * di_pad]
    k = qkv[:, 1 * di_pad:2 * di_pad]
    v = qkv[:, 2 * di_pad:3 * di_pad]

    # ---- Scaled dot-product attention (scale uses d_model, matching the module). ----
    scores = lax.dot_general(q, k, (((1,), (1,)), ((), ())),
                             preferred_element_type=jnp.float32)    # [S_pad, S_pad]
    scores = scores * (1.0 / math.sqrt(d_model))
    key_pos = lax.broadcasted_iota(jnp.int32, scores.shape, 1)
    scores = jnp.where(key_pos < seq_len, scores, -1e30)            # mask padded keys
    scores = scores - jnp.max(scores, axis=-1, keepdims=True)
    p = jnp.exp(scores)
    inv_denom = pl.reciprocal(jnp.sum(p, axis=-1, keepdims=True), approx=True)
    p = p * inv_denom
    attn = jnp.dot(p, v, preferred_element_type=jnp.float32)        # [S_pad, Di_pad]
    attn_ref[...] = attn

    # ---- ReLU -> Linear(d_internal, d_internal) with bias. ----
    relu = jnp.maximum(attn, 0.0)
    step = jnp.dot(relu, wlin_t_ref[...],
                   preferred_element_type=jnp.float32) + blin_ref[...]

    # ---- Output Linear -> log_softmax over the real classes only. ----
    logits = jnp.dot(step, wout_t_ref[...],
                     preferred_element_type=jnp.float32) + bout_ref[...]
    cls_pos = lax.broadcasted_iota(jnp.int32, logits.shape, 1)
    logits = jnp.where(cls_pos < num_classes, logits, -1e30)        # mask padded classes
    m = jnp.max(logits, axis=-1, keepdims=True)
    sh = logits - m
    logp_ref[...] = sh - jnp.log(jnp.sum(jnp.exp(sh), axis=-1, keepdims=True))


def _round_up(n, m):
    return ((n + m - 1) // m) * m


def _pad2(x, shape):
    out = jnp.zeros(shape, x.dtype)
    return out.at[:x.shape[0], :x.shape[1]].set(x)


def prepare_params(params, max_seq_len):
    """Zero-pad and pack the weights into TPU-friendly (sublane, lane) shapes.
    Done once, outside the jitted forward. Zero padding is exact w.r.t. the
    original math."""
    emb, pos = params["emb"], params["pos_emb"]
    wq, wk, wv = params["wq"], params["wk"], params["wv"]
    wlin, blin = params["wlin"], params["blin"]
    wout, bout = params["wout"], params["bout"]

    vocab, d_model = emb.shape
    num_positions = pos.shape[0]
    d_internal = wq.shape[1]
    num_classes = wout.shape[0]

    s_pad = _round_up(max(max_seq_len, num_positions, SUBLANE), SUBLANE)
    v_pad = _round_up(max(vocab, SUBLANE), LANE)
    d_pad = _round_up(d_model, LANE)
    di_pad = _round_up(d_internal, LANE)
    c_pad = _round_up(num_classes, LANE)

    # Pack W_Q / W_K / W_V into one [D_pad, 3*Di_pad] weight.
    wqkv = jnp.zeros((d_pad, 3 * di_pad), jnp.float32)
    wqkv = wqkv.at[:d_model, 0 * di_pad:0 * di_pad + d_internal].set(wq)
    wqkv = wqkv.at[:d_model, 1 * di_pad:1 * di_pad + d_internal].set(wk)
    wqkv = wqkv.at[:d_model, 2 * di_pad:2 * di_pad + d_internal].set(wv)

    prepared = {
        "emb":    _pad2(emb, (v_pad, d_pad)),
        "pos":    _pad2(pos, (s_pad, d_pad)),
        "wqkv":   wqkv,
        "wlin_t": _pad2(wlin.T, (di_pad, di_pad)),
        "blin":   _pad2(blin.reshape(1, -1), (1, di_pad)),
        "wout_t": _pad2(wout.T, (di_pad, c_pad)),
        "bout":   _pad2(bout.reshape(1, -1), (1, c_pad)),
    }
    dims = {
        "d_model": d_model, "d_internal": d_internal, "num_classes": num_classes,
        "num_positions": num_positions,
        "s_pad": s_pad, "di_pad": di_pad, "c_pad": c_pad,
    }
    return prepared, dims


def transformer_forward(prepared, indices, *, dims):
    """Forward pass: the only per-call JAX-side work is padding the int32 index
    vector and slicing the padded outputs; gather, all matmuls, softmax and
    log-softmax run inside one Pallas kernel."""
    seq_len = indices.shape[0]
    if seq_len > dims["num_positions"]:
        raise ValueError("sequence longer than the positional-encoding table")

    s_pad, di_pad, c_pad = dims["s_pad"], dims["di_pad"], dims["c_pad"]

    idx_p = jnp.zeros((s_pad, 1), jnp.int32).at[:seq_len, 0].set(
        indices.astype(jnp.int32))

    args = (idx_p, prepared["emb"], prepared["pos"], prepared["wqkv"],
            prepared["wlin_t"], prepared["blin"], prepared["wout_t"],
            prepared["bout"])

    def full_spec(shape):
        return pl.BlockSpec(shape, lambda i: (0,) * len(shape))

    kernel = functools.partial(_transformer_kernel, dims["d_model"], seq_len,
                               dims["num_classes"], di_pad)

    logp_pad, attn_pad = pl.pallas_call(
        kernel,
        grid=(1,),
        in_specs=[full_spec(a.shape) for a in args],
        out_specs=(full_spec((s_pad, c_pad)), full_spec((s_pad, di_pad))),
        out_shape=(
            jax.ShapeDtypeStruct((s_pad, c_pad), jnp.float32),
            jax.ShapeDtypeStruct((s_pad, di_pad), jnp.float32),
        ),
        compiler_params=pltpu.CompilerParams(
            dimension_semantics=("arbitrary",)),
    )(*args)

    logp = logp_pad[:seq_len, :dims["num_classes"]]
    attn = attn_pad[:seq_len, :dims["d_internal"]]
    return logp, attn


def _reference_forward(params, indices):
    """Pure-JAX reference of the same math (for a sanity check)."""
    x = jnp.take(params["emb"], indices, axis=0) + params["pos_emb"][: indices.shape[0]]
    d_model = params["emb"].shape[1]
    q = x @ params["wq"]
    k = x @ params["wk"]
    v = x @ params["wv"]
    scores = (q @ k.T) / math.sqrt(d_model)
    p = jax.nn.softmax(scores, axis=-1)
    attn = p @ v
    step = jnp.maximum(attn, 0.0) @ params["wlin"].T + params["blin"]
    logits = step @ params["wout"].T + params["bout"]
    return jax.nn.log_softmax(logits, axis=-1), attn


def init_params(key, vocab_size, num_positions, d_model, d_internal, num_classes):
    ks = jax.random.split(key, 9)
    scale = 0.1
    return {
        "emb":     scale * jax.random.normal(ks[0], (vocab_size, d_model), jnp.float32),
        "pos_emb": scale * jax.random.normal(ks[1], (num_positions, d_model), jnp.float32),
        "wq":      scale * jax.random.normal(ks[2], (d_model, d_internal), jnp.float32),
        "wk":      scale * jax.random.normal(ks[3], (d_model, d_internal), jnp.float32),
        "wv":      scale * jax.random.normal(ks[4], (d_model, d_internal), jnp.float32),
        "wlin":    scale * jax.random.normal(ks[5], (d_internal, d_internal), jnp.float32),
        "blin":    scale * jax.random.normal(ks[6], (d_internal,), jnp.float32),
        "wout":    scale * jax.random.normal(ks[7], (num_classes, d_internal), jnp.float32),
        "bout":    scale * jax.random.normal(ks[8], (num_classes,), jnp.float32),
    }


if __name__ == "__main__":
    vocab_size, num_positions = 10, 20
    d_model, d_internal, num_classes = 32, 16, 3
    seq_len = 20   # matches the docstring "20x3 matrix" output

    key = jax.random.PRNGKey(0)
    pkey, ikey = jax.random.split(key)
    params = init_params(pkey, vocab_size, num_positions, d_model, d_internal,
                         num_classes)
    indices = jax.random.randint(ikey, (seq_len,), 0, vocab_size, dtype=jnp.int32)

    prepared, dims = prepare_params(params, max_seq_len=seq_len)
    fwd = jax.jit(functools.partial(transformer_forward, dims=dims))

    logp, attn = fwd(prepared, indices)
    jax.block_until_ready((logp, attn))

    ref_logp, ref_attn = _reference_forward(params, indices)
    assert logp.shape == (seq_len, num_classes)
    assert attn.shape == (seq_len, d_internal)
    assert jnp.allclose(logp, ref_logp, rtol=2e-3, atol=2e-3)
    assert jnp.allclose(attn, ref_attn, rtol=2e-3, atol=2e-3)

    print("KERNEL_OK")
</pallas_src>

<mosaic_0001>
module attributes {stable_mosaic.version = 11 : i64} {
  func.func @_transformer_kernel(%arg0: i32, %arg1: memref<24x1xi32, #tpu.memory_space<vmem>>, %arg2: memref<128x128xf32, #tpu.memory_space<vmem>>, %arg3: memref<24x128xf32, #tpu.memory_space<vmem>>, %arg4: memref<128x384xf32, #tpu.memory_space<vmem>>, %arg5: memref<128x128xf32, #tpu.memory_space<vmem>>, %arg6: memref<1x128xf32, #tpu.memory_space<vmem>>, %arg7: memref<128x128xf32, #tpu.memory_space<vmem>>, %arg8: memref<1x128xf32, #tpu.memory_space<vmem>>, %arg9: memref<24x128xf32, #tpu.memory_space<vmem>>, %arg10: memref<24x128xf32, #tpu.memory_space<vmem>>) attributes {dimension_semantics = [#tpu.dimension_semantics<arbitrary>], iteration_bounds = array<i64: 1>, scalar_prefetch = 0 : i64, scratch_operands = 0 : i64, tpu.core_type = #tpu.core_type<tc>, window_params = [{pipeline_mode = #tpu.pipeline_mode<synchronous>, transform_indices = @transform_0, window_bounds = array<i64: 24, 1>}, {pipeline_mode = #tpu.pipeline_mode<synchronous>, transform_indices = @transform_1, window_bounds = array<i64: 128, 128>}, {pipeline_mode = #tpu.pipeline_mode<synchronous>, transform_indices = @transform_2, window_bounds = array<i64: 24, 128>}, {pipeline_mode = #tpu.pipeline_mode<synchronous>, transform_indices = @transform_3, window_bounds = array<i64: 128, 384>}, {pipeline_mode = #tpu.pipeline_mode<synchronous>, transform_indices = @transform_4, window_bounds = array<i64: 128, 128>}, {pipeline_mode = #tpu.pipeline_mode<synchronous>, transform_indices = @transform_5, window_bounds = array<i64: 1, 128>}, {pipeline_mode = #tpu.pipeline_mode<synchronous>, transform_indices = @transform_6, window_bounds = array<i64: 128, 128>}, {pipeline_mode = #tpu.pipeline_mode<synchronous>, transform_indices = @transform_7, window_bounds = array<i64: 1, 128>}, {pipeline_mode = #tpu.pipeline_mode<synchronous>, transform_indices = @transform_8, window_bounds = array<i64: 24, 128>}, {pipeline_mode = #tpu.pipeline_mode<synchronous>, transform_indices = @transform_9, window_bounds = array<i64: 24, 128>}]} {
    %c0 = arith.constant 0 : index
    %c0_0 = arith.constant 0 : index
    %0 = vector.load %arg1[%c0, %c0_0] : memref<24x1xi32, #tpu.memory_space<vmem>>, vector<24x1xi32>
    %1 = tpu.iota {dimensions = array<i32: 1>} : vector<24x128xi32>
    %2 = vector.broadcast %0 : vector<24x1xi32> to vector<24x128xi32>
    %3 = arith.cmpi eq, %1, %2 : vector<24x128xi32>
    %4 = arith.extui %3 : vector<24x128xi1> to vector<24x128xi32>
    %5 = arith.sitofp %4 : vector<24x128xi32> to vector<24x128xf32>
    %c0_1 = arith.constant 0 : index
    %c0_2 = arith.constant 0 : index
    %6 = vector.load %arg2[%c0_1, %c0_2] : memref<128x128xf32, #tpu.memory_space<vmem>>, vector<128x128xf32>
    %cst = arith.constant dense<0.000000e+00> : vector<24x128xf32>
    %7 = tpu.matmul %5, %6, %cst {dimension_numbers = #tpu.dot_dimension_numbers<[1], [0], [0], [1], [0, 0, 1, 1], [], []>} : vector<24x128xf32>, vector<128x128xf32>, vector<24x128xf32> -> vector<24x128xf32>
    %c0_3 = arith.constant 0 : index
    %c0_4 = arith.constant 0 : index
    %8 = vector.load %arg3[%c0_3, %c0_4] : memref<24x128xf32, #tpu.memory_space<vmem>>, vector<24x128xf32>
    %9 = arith.addf %7, %8 : vector<24x128xf32>
    %c0_5 = arith.constant 0 : index
    %c0_6 = arith.constant 0 : index
    %10 = vector.load %arg4[%c0_5, %c0_6] : memref<128x384xf32, #tpu.memory_space<vmem>>, vector<128x384xf32>
    %cst_7 = arith.constant dense<0.000000e+00> : vector<24x384xf32>
    %11 = tpu.matmul %9, %10, %cst_7 {dimension_numbers = #tpu.dot_dimension_numbers<[1], [0], [0], [1], [0, 0, 1, 1], [], []>} : vector<24x128xf32>, vector<128x384xf32>, vector<24x384xf32> -> vector<24x384xf32>
    %12 = vector.extract_strided_slice %11 {offsets = [0, 0], sizes = [24, 128], strides = [1, 1]} : vector<24x384xf32> to vector<24x128xf32>
    %13 = vector.extract_strided_slice %11 {offsets = [0, 128], sizes = [24, 128], strides = [1, 1]} : vector<24x384xf32> to vector<24x128xf32>
    %14 = vector.extract_strided_slice %11 {offsets = [0, 256], sizes = [24, 128], strides = [1, 1]} : vector<24x384xf32> to vector<24x128xf32>
    %cst_8 = arith.constant dense<0.000000e+00> : vector<24x24xf32>
    %15 = tpu.matmul %12, %13, %cst_8 {dimension_numbers = #tpu.dot_dimension_numbers<[1], [1], [0], [0], [0, 0, 1, 0], [], []>} : vector<24x128xf32>, vector<24x128xf32>, vector<24x24xf32> -> vector<24x24xf32>
    %cst_9 = arith.constant 0.176776692 : f32
    %16 = vector.broadcast %cst_9 : f32 to vector<24x24xf32>
    %17 = arith.mulf %15, %16 : vector<24x24xf32>
    %18 = tpu.iota {dimensions = array<i32: 1>} : vector<24x24xi32>
    %c20_i32 = arith.constant 20 : i32
    %19 = vector.broadcast %c20_i32 : i32 to vector<24x24xi32>
    %20 = arith.cmpi slt, %18, %19 : vector<24x24xi32>
    %cst_10 = arith.constant -1.000000e+30 : f32
    %21 = vector.broadcast %cst_10 : f32 to vector<24x24xf32>
    %22 = arith.select %20, %17, %21 : vector<24x24xi1>, vector<24x24xf32>
    %cst_11 = arith.constant dense<0xFF800000> : vector<24xf32>
    %23 = vector.multi_reduction <maximumf>, %22, %cst_11 [1] : vector<24x24xf32> to vector<24xf32>
    %24 = vector.shape_cast %23 : vector<24xf32> to vector<24x1xf32>
    %25 = vector.broadcast %24 : vector<24x1xf32> to vector<24x24xf32>
    %26 = arith.subf %22, %25 : vector<24x24xf32>
    %27 = math.exp %26 : vector<24x24xf32>
    %cst_12 = arith.constant dense<0.000000e+00> : vector<24xf32>
    %28 = vector.multi_reduction <add>, %27, %cst_12 [1] : vector<24x24xf32> to vector<24xf32>
    %29 = vector.shape_cast %28 : vector<24xf32> to vector<24x1xf32>
    %30 = tpu.reciprocal %29 {approx = true} : vector<24x1xf32> -> vector<24x1xf32>
    %31 = vector.broadcast %30 : vector<24x1xf32> to vector<24x24xf32>
    %32 = arith.mulf %27, %31 : vector<24x24xf32>
    %cst_13 = arith.constant dense<0.000000e+00> : vector<24x128xf32>
    %33 = tpu.matmul %32, %14, %cst_13 {dimension_numbers = #tpu.dot_dimension_numbers<[1], [0], [0], [1], [0, 0, 1, 1], [], []>} : vector<24x24xf32>, vector<24x128xf32>, vector<24x128xf32> -> vector<24x128xf32>
    %c0_14 = arith.constant 0 : index
    %c0_15 = arith.constant 0 : index
    %34 = vector.load %arg10[%c0_14, %c0_15] : memref<24x128xf32, #tpu.memory_space<vmem>>, vector<24x128xf32>
    tpu.vector_store %arg10[%c0_14, %c0_15], %33 {strides = array<i32>} : memref<24x128xf32, #tpu.memory_space<vmem>>, vector<24x128xf32>,
    %cst_16 = arith.constant 0.000000e+00 : f32
    %35 = vector.broadcast %cst_16 : f32 to vector<24x128xf32>
    %36 = arith.maximumf %33, %35 : vector<24x128xf32>
    %c0_17 = arith.constant 0 : index
    %c0_18 = arith.constant 0 : index
    %37 = vector.load %arg5[%c0_17, %c0_18] : memref<128x128xf32, #tpu.memory_space<vmem>>, vector<128x128xf32>
    %cst_19 = arith.constant dense<0.000000e+00> : vector<24x128xf32>
    %38 = tpu.matmul %36, %37, %cst_19 {dimension_numbers = #tpu.dot_dimension_numbers<[1], [0], [0], [1], [0, 0, 1, 1], [], []>} : vector<24x128xf32>, vector<128x128xf32>, vector<24x128xf32> -> vector<24x128xf32>
    %c0_20 = arith.constant 0 : index
    %c0_21 = arith.constant 0 : index
    %39 = vector.load %arg6[%c0_20, %c0_21] : memref<1x128xf32, #tpu.memory_space<vmem>>, vector<1x128xf32>
    %40 = vector.broadcast %39 : vector<1x128xf32> to vector<24x128xf32>
    %41 = arith.addf %38, %40 : vector<24x128xf32>
    %c0_22 = arith.constant 0 : index
    %c0_23 = arith.constant 0 : index
    %42 = vector.load %arg7[%c0_22, %c0_23] : memref<128x128xf32, #tpu.memory_space<vmem>>, vector<128x128xf32>
    %cst_24 = arith.constant dense<0.000000e+00> : vector<24x128xf32>
    %43 = tpu.matmul %41, %42, %cst_24 {dimension_numbers = #tpu.dot_dimension_numbers<[1], [0], [0], [1], [0, 0, 1, 1], [], []>} : vector<24x128xf32>, vector<128x128xf32>, vector<24x128xf32> -> vector<24x128xf32>
    %c0_25 = arith.constant 0 : index
    %c0_26 = arith.constant 0 : index
    %44 = vector.load %arg8[%c0_25, %c0_26] : memref<1x128xf32, #tpu.memory_space<vmem>>, vector<1x128xf32>
    %45 = vector.broadcast %44 : vector<1x128xf32> to vector<24x128xf32>
    %46 = arith.addf %43, %45 : vector<24x128xf32>
    %47 = tpu.iota {dimensions = array<i32: 1>} : vector<24x128xi32>
    %c3_i32 = arith.constant 3 : i32
    %48 = vector.broadcast %c3_i32 : i32 to vector<24x128xi32>
    %49 = arith.cmpi slt, %47, %48 : vector<24x128xi32>
    %cst_27 = arith.constant -1.000000e+30 : f32
    %50 = vector.broadcast %cst_27 : f32 to vector<24x128xf32>
    %51 = arith.select %49, %46, %50 : vector<24x128xi1>, vector<24x128xf32>
    %cst_28 = arith.constant dense<0xFF800000> : vector<24xf32>
    %52 = vector.multi_reduction <maximumf>, %51, %cst_28 [1] : vector<24x128xf32> to vector<24xf32>
    %53 = vector.shape_cast %52 : vector<24xf32> to vector<24x1xf32>
    %54 = vector.broadcast %53 : vector<24x1xf32> to vector<24x128xf32>
    %55 = arith.subf %51, %54 : vector<24x128xf32>
    %56 = math.exp %55 : vector<24x128xf32>
    %cst_29 = arith.constant dense<0.000000e+00> : vector<24xf32>
    %57 = vector.multi_reduction <add>, %56, %cst_29 [1] : vector<24x128xf32> to vector<24xf32>
    %58 = vector.shape_cast %57 : vector<24xf32> to vector<24x1xf32>
    %59 = math.log %58 : vector<24x1xf32>
    %60 = vector.broadcast %59 : vector<24x1xf32> to vector<24x128xf32>
    %61 = arith.subf %55, %60 : vector<24x128xf32>
    %c0_30 = arith.constant 0 : index
    %c0_31 = arith.constant 0 : index
    %62 = vector.load %arg9[%c0_30, %c0_31] : memref<24x128xf32, #tpu.memory_space<vmem>>, vector<24x128xf32>
    tpu.vector_store %arg9[%c0_30, %c0_31], %61 {strides = array<i32>} : memref<24x128xf32, #tpu.memory_space<vmem>>, vector<24x128xf32>,
    return
  }
  func.func @transform_0(%arg0: i32) -> (i32, i32) {
    %c0_i32 = arith.constant 0 : i32
    %c0_i32_0 = arith.constant 0 : i32
    %c0_i32_1 = arith.constant 0 : i32
    return %c0_i32, %c0_i32_0 : i32, i32
  }
  func.func @transform_1(%arg0: i32) -> (i32, i32) {
    %c0_i32 = arith.constant 0 : i32
    %c0_i32_0 = arith.constant 0 : i32
    %c0_i32_1 = arith.constant 0 : i32
    return %c0_i32, %c0_i32_0 : i32, i32
  }
  func.func @transform_2(%arg0: i32) -> (i32, i32) {
    %c0_i32 = arith.constant 0 : i32
    %c0_i32_0 = arith.constant 0 : i32
    %c0_i32_1 = arith.constant 0 : i32
    return %c0_i32, %c0_i32_0 : i32, i32
  }
  func.func @transform_3(%arg0: i32) -> (i32, i32) {
    %c0_i32 = arith.constant 0 : i32
    %c0_i32_0 = arith.constant 0 : i32
    %c0_i32_1 = arith.constant 0 : i32
    return %c0_i32, %c0_i32_0 : i32, i32
  }
  func.func @transform_4(%arg0: i32) -> (i32, i32) {
    %c0_i32 = arith.constant 0 : i32
    %c0_i32_0 = arith.constant 0 : i32
    %c0_i32_1 = arith.constant 0 : i32
    return %c0_i32, %c0_i32_0 : i32, i32
  }
  func.func @transform_5(%arg0: i32) -> (i32, i32) {
    %c0_i32 = arith.constant 0 : i32
    %c0_i32_0 = arith.constant 0 : i32
    %c0_i32_1 = arith.constant 0 : i32
    return %c0_i32, %c0_i32_0 : i32, i32
  }
  func.func @transform_6(%arg0: i32) -> (i32, i32) {
    %c0_i32 = arith.constant 0 : i32
    %c0_i32_0 = arith.constant 0 : i32
    %c0_i32_1 = arith.constant 0 : i32
    return %c0_i32, %c0_i32_0 : i32, i32
  }
  func.func @transform_7(%arg0: i32) -> (i32, i32) {
    %c0_i32 = arith.constant 0 : i32
    %c0_i32_0 = arith.constant 0 : i32
    %c0_i32_1 = arith.constant 0 : i32
    return %c0_i32, %c0_i32_0 : i32, i32
  }
  func.func @transform_8(%arg0: i32) -> (i32, i32) {
    %c0_i32 = arith.constant 0 : i32
    %c0_i32_0 = arith.constant 0 : i32
    %c0_i32_1 = arith.constant 0 : i32
    return %c0_i32, %c0_i32_0 : i32, i32
  }
  func.func @transform_9(%arg0: i32) -> (i32, i32) {
    %c0_i32 = arith.constant 0 : i32
    %c0_i32_0 = arith.constant 0 : i32
    %c0_i32_1 = arith.constant 0 : i32
    return %c0_i32, %c0_i32_0 : i32, i32
  }
}

</mosaic_0001>

<bundles_post_ra>
// kernel: transformer_forward.1
= control target key start
LH: loop header
LB: loop body
LE: loop exit
PB: predicated region body
PF: predicated region fallthrough
CT: control target
= control target key end

     0   :  { %15 = vsyncpa [#allocation3], 0  ;;  %s1715_s0 = inlined_call_operand.vmem [shape: s32[24,1], index: 0, kind: input, shape index: {}]   ;;  %s1716_s1 = inlined_call_operand.hbm [shape: f32[128,128], index: 1, kind: input, shape index: {}]   ;;  %s1717_s2 = inlined_call_operand.vmem [shape: f32[24,128], index: 2, kind: input, shape index: {}]   ;;  %s1718_s3 = inlined_call_operand.hbm [shape: f32[128,384], index: 3, kind: input, shape index: {}]   ;;  %s1719_s4 = inlined_call_operand.hbm [shape: f32[128,128], index: 4, kind: input, shape index: {}]   ;;  %s1720_s5 = inlined_call_operand.vmem [shape: f32[1,128], index: 5, kind: input, shape index: {}]   ;;  %s1721_s6 = inlined_call_operand.hbm [shape: f32[128,128], index: 6, kind: input, shape index: {}]   ;;  %s1722_s7 = inlined_call_operand.vmem [shape: f32[1,128], index: 7, kind: input, shape index: {}]   ;;  %s1723_s8 = inlined_call_operand.vmem [shape: f32[24,128], index: 8, kind: output, shape index: {0}]   ;;  %s1724_s9 = inlined_call_operand.vmem [shape: f32[24,128], index: 9, kind: output, shape index: {1}]  }
   0x1   :  { %16 = vsyncpa [#allocation5], 0 }
   0x2   :  { %17 = vsyncpa [#allocation8], 0  ;;  %s1449_s30 = smov [#allocation4]   ;;  %s1355_s13 = scalar_lea.hbm %s1718_s3, 6144 }
   0x3   :  { %s39_s10 = sshll.u32 %s1449_s30, 4  ;;  %p1356_p0 = scmp.ne.s32.totalorder %s1718_s3, %s1355_s13  ;;  %s40_s10 = int_to_ptr.vmem [resolvable:$true] %s39_s10 }
   0x4   :  { %p1359_p1 = scmp.lt.u32.totalorder %s1355_s13, %s1718_s3 }
   0x6   :  { %p1361_p2 = pnand %p1359_p1, %p1356_p0 }
   0x8   :  { %1364 = shalt.err (!%p1361_p2)
}
   0x9   :  { %s1365_s18 = scalar_lea.vmem %s40_s10, 6144  ;;  %p1370_p4 = scmp.lt.s32.totalorder %s40_s10, %s40_s10 }
   0xa   :  { %p1366_p3 = scmp.ne.s32.totalorder %s40_s10, %s1365_s18  ;;  %p1371_p5 = scmp.lt.s32.totalorder %s1365_s18, %s1365_s18 }
   0xc   :  { %p1372_p6 = por %p1371_p5, %p1370_p4 }
   0xe   :  { %p1373_p7 = pnand %p1372_p6, %p1366_p3 }
  0x10   :  { %1376 = shalt.err (!%p1373_p7)
}
  0x11   :  { %s1450_s19 = smov 384   ;;  %s1451_s20 = smov 24  }
  0x12   :  { %45 = dma.hbm_to_vmem [thread:$0]  %s1718_s3, 6144, %s40_s10, [#allocation5], %s1450_s19, %s1450_s19, %s1451_s20  }
  0x13   :  { %s1452_s23 = smov [#allocation2]   ;;  %s1377_s27 = scalar_lea.hbm %s1716_s1, 2048 }
  0x14   :  { %s25_s24 = sshll.u32 %s1452_s23, 4  ;;  %p1378_p8 = scmp.ne.s32.totalorder %s1716_s1, %s1377_s27  ;;  %s26_s24 = int_to_ptr.vmem [resolvable:$true] %s25_s24 }
  0x15   :  { %p1381_p9 = scmp.lt.u32.totalorder %s1377_s27, %s1716_s1 }
  0x17   :  { %p1383_p10 = pnand %p1381_p9, %p1378_p8 }
  0x19   :  { %1386 = shalt.err (!%p1383_p10)
}
  0x1a   :  { %s1387_s12 = scalar_lea.vmem %s26_s24, 2048  ;;  %p1392_p12 = scmp.lt.s32.totalorder %s26_s24, %s26_s24 }
  0x1b   :  { %p1388_p11 = scmp.ne.s32.totalorder %s26_s24, %s1387_s12  ;;  %p1393_p13 = scmp.lt.s32.totalorder %s1387_s12, %s1387_s12 }
  0x1d   :  { %p1394_p0 = por %p1393_p13, %p1392_p12 }
  0x1f   :  { %p1395_p1 = pnand %p1394_p0, %p1388_p11 }
  0x21   :  { %1398 = shalt.err (!%p1395_p1)
}
  0x22   :  { %s1453_s3 = smov 128   ;;  %s1454_s10 = smov 8  }
  0x23   :  { %31 = dma.hbm_to_vmem [thread:$0]  %s1716_s1, 2048, %s26_s24, [#allocation3], %s1453_s3, %s1453_s3, %s1454_s10  }
  0x24   :  { %s1455_s15 = smov [#allocation6]   ;;  %s1456_s17 = smov [#allocation7]  }
  0x25   :  { %s51_s16 = sshll.u32 %s1455_s15, 4  ;;  %s65_s18 = sshll.u32 %s1456_s17, 4  ;;  %s52_s16 = int_to_ptr.vmem [resolvable:$true] %s51_s16  ;;  %s1539_s18 = int_to_ptr.vmem [resolvable:$true] %s65_s18 }
  0x26   :  { %s1399_s21 = scalar_lea.hbm %s1719_s4, 2048 }
  0x27   :  { %p1400_p2 = scmp.ne.s32.totalorder %s1719_s4, %s1399_s21  ;;  %p1403_p3 = scmp.lt.u32.totalorder %s1399_s21, %s1719_s4 }
  0x29   :  { %p1405_p4 = pnand %p1403_p3, %p1400_p2 }
  0x2b   :  { %1408 = shalt.err (!%p1405_p4)
}
  0x2c   :  { %s1409_s1 = scalar_lea.vmem %s52_s16, 2048  ;;  %p1414_p6 = scmp.lt.s32.totalorder %s52_s16, %s52_s16 }
  0x2d   :  { %p1410_p5 = scmp.ne.s32.totalorder %s52_s16, %s1409_s1  ;;  %p1415_p7 = scmp.lt.s32.totalorder %s1409_s1, %s1409_s1 }
  0x2f   :  { %p1416_p8 = por %p1415_p7, %p1414_p6 }
  0x31   :  { %p1417_p9 = pnand %p1416_p8, %p1410_p5 }
  0x33   :  { %1420 = shalt.err (!%p1417_p9)
}
  0x34   :  { %57 = dma.hbm_to_vmem [thread:$0]  %s1719_s4, 2048, %s52_s16, [#allocation5], %s1453_s3, %s1453_s3, %s1454_s10  }
  0x35   :  { %s1421_s30 = scalar_lea.hbm %s1721_s6, 2048 }
  0x36   :  { %p1422_p10 = scmp.ne.s32.totalorder %s1721_s6, %s1421_s30  ;;  %p1425_p11 = scmp.lt.u32.totalorder %s1421_s30, %s1721_s6 }
  0x38   :  { %p1427_p12 = pnand %p1425_p11, %p1422_p10 }
  0x3a   :  { %1430 = shalt.err (!%p1427_p12)
}
  0x3b   :  { %s1431_s15 = scalar_lea.vmem %s1539_s18, 2048  ;;  %p1436_p0 = scmp.lt.s32.totalorder %s1539_s18, %s1539_s18 }
  0x3c   :  { %p1432_p13 = scmp.ne.s32.totalorder %s1539_s18, %s1431_s15  ;;  %p1437_p1 = scmp.lt.s32.totalorder %s1431_s15, %s1431_s15 }
  0x3e   :  { %p1438_p2 = por %p1437_p1, %p1436_p0 }
  0x40   :  { %p1439_p3 = pnand %p1438_p2, %p1432_p13 }
  0x42   :  { %1442 = shalt.err (!%p1439_p3)
}
  0x43   :  { %71 = dma.hbm_to_vmem [thread:$0]  %s1721_s6, 2048, %s1539_s18, [#allocation8], %s1453_s3, %s1453_s3, %s1454_s10  }
  0x44   :  { %1443 = dma.done.wait [#allocation3], 2048  }
  0x45   :  { %1444 = vsyncadd [#allocation3], 4294965248 }
  0x46   :  { %1445 = dma.done.wait [#allocation5], 8192  }
  0x47   :  { %1446 = vsyncadd [#allocation5], 4294959104 }
  0x48   :  { %1447 = dma.done.wait [#allocation8], 2048  }
  0x49   :  { %1448 = vsyncadd [#allocation8], 4294965248  ;;  %v1457_v0 = vmov 0   ;;  %v1458_v1 = vmov 0.0|0.0   ;;  %v86_v2 = vld [vmem:[%s1715_s0] sm:$0xff]  ;;  %v88_v3 = vld [vmem:[%s1715_s0 + $0x10] sm:$0xff] }
  0x4a   :  { %1329 = vset.pattern.permute.xlu0 %v1457_v0  ;;  %1330 = vset.pattern.permute.xlu1 %v1457_v0  ;;  %v109_v4 = vld [vmem:[#allocation2] sm:$0xff]  ;;  %v110_v5 = vld [vmem:[#allocation2 + $0x8] sm:$0xff]  ;;  %v111_v6 = vld [vmem:[#allocation2 + $0x10] sm:$0xff]  ;;  %vm1459_vm0 = vmmov 0   ;;  %v1460_v10 = vmov 0.0   ;;  %vm506_vm5 = vcmask 195584  }
  0x4b   :  { %1182 = vmatprep.subr.bf16.mxu0 %v1458_v1  ;;  %92 = vperm.xlu0 %1329, %v86_v2   ;;  %v87_v7 = vld [vmem:[%s1715_s0 + $0x8] sm:$0xff]  ;;  %v1183_v8 = vpack.c.bf16 %v110_v5, %v109_v4  ;;  %v112_v9 = vld [vmem:[#allocation2 + $0x18] sm:$0xff]  ;;  %v113_v12 = vld [vmem:[#allocation2 + $0x20] sm:$0xff] }
  0x4c   :  { %98 = vperm.xlu1 %1330, %v88_v3   ;;  %1020 = vmatprep.mubr.msk.f32.mxu0 %vm1459_vm0, %v1460_v10  ;;  %v1186_v11 = vpack.c.bf16 %v112_v9, %v111_v6  ;;  %v114_v13 = vld [vmem:[#allocation2 + $0x28] sm:$0xff]  ;;  %v115_v15 = vld [vmem:[#allocation2 + $0x30] sm:$0xff]  ;;  %v116_v16 = vld [vmem:[#allocation2 + $0x38] sm:$0xff] }
  0x4d   :  { %320 = vmatprep.mubr.f32.mxu1 %v1460_v10  ;;  %1184 = vmatpush3.bf16.msra.mxu0 %v1183_v8  ;;  %v1189_v14 = vpack.c.bf16 %v114_v13, %v113_v12  ;;  %v209_v17 = vld [vmem:[#allocation4 + $0x8] sm:$0xff]  ;;  %v212_v18 = vld [vmem:[#allocation4 + $0x20] sm:$0xff]  ;;  %v211_v21 = vld [vmem:[#allocation4 + $0x18] sm:$0xff]  ;;  %v1192_v22 = vpack.c.bf16 %v116_v16, %v115_v15  ;;  %v89_v13 = vlaneseq }
  0x4e   :  { %1185 = vmatprep.subr.bf16.mxu0 %v1458_v1  ;;  %v208_v19 = vld [vmem:[#allocation4] sm:$0xff]  ;;  %v1206_v20 = vpack.c.bf16 %v212_v18, %v209_v17  ;;  %v215_v24 = vld [vmem:[#allocation4 + $0x38] sm:$0xff]  ;;  %v218_v25 = vld [vmem:[#allocation4 + $0x50] sm:$0xff] }
  0x4f   :  { %95 = vperm.xlu0 %1329, %v87_v7   ;;  %v1208_v23 = vpack.c.bf16 %v211_v21, %v208_v19  ;;  %v214_v26 = vld [vmem:[#allocation4 + $0x30] sm:$0xff]  ;;  %v117_v27 = vld [vmem:[#allocation2 + $0x40] sm:$0xff]  ;;  %v118_v28 = vld [vmem:[#allocation2 + $0x48] sm:$0xff]  ;;  %v1210_v29 = vpack.c.bf16 %v218_v25, %v215_v24  ;;  %v1597_v16 = vand.u32 127, %v89_v13  ;;  %v1461_v21 = vmov 1.0  }
  0x50   :  { %1207 = vmatprep.subr.bf16.mxu1 %v1206_v20  ;;  %v217_v30 = vld [vmem:[#allocation4 + $0x48] sm:$0xff]  ;;  %v224_v33 = vld [vmem:[#allocation4 + $0x80] sm:$0xff]  ;;  %v223_v36 = vld [vmem:[#allocation4 + $0x78] sm:$0xff]  ;;  %v1195_v37 = vpack.c.bf16 %v118_v28, %v117_v27 }
  0x51   :  { %1187 = vmatpush3.bf16.msra.mxu0 %v1186_v11  ;;  %1209 = vmatpush1.bf16.msra.mxu1 %v1208_v23  ;;  %v1212_v31 = vpack.c.bf16 %v217_v30, %v214_v26  ;;  %v221_v32 = vld [vmem:[#allocation4 + $0x68] sm:$0xff]  ;;  %v220_v35 = vld [vmem:[#allocation4 + $0x60] sm:$0xff]  ;;  %v227_v38 = vld [vmem:[#allocation4 + $0x98] sm:$0xff]  ;;  %vm502_vm4 = vcmp.lt.s32.totalorder %v1597_v16, 20  ;;  %vm841_vm6 = vcmp.lt.s32.totalorder %v1597_v16, 3 }
  0x52   :  { %1188 = vmatprep.subr.bf16.mxu0 %v1458_v1  ;;  %1211 = vmatprep.subr.bf16.mxu1 %v1210_v29  ;;  %v1214_v34 = vpack.c.bf16 %v224_v33, %v221_v32  ;;  %v230_v39 = vld [vmem:[#allocation4 + $0xb0] sm:$0xff]  ;;  %v120_v41 = vld [vmem:[#allocation2 + $0x58] sm:$0xff]  ;;  %v1216_v42 = vpack.c.bf16 %v223_v36, %v220_v35  ;;  %v229_v45 = vld [vmem:[#allocation4 + $0xa8] sm:$0xff] }
  0x53   :  { %v119_v40 = vld [vmem:[#allocation2 + $0x50] sm:$0xff]  ;;  %v1218_v43 = vpack.c.bf16 %v230_v39, %v227_v38  ;;  %v233_v47 = vld [vmem:[#allocation4 + $0xc8] sm:$0xff]  ;;  %v236_v48 = vld [vmem:[#allocation4 + $0xe0] sm:$0xff] }
  0x54   :  { %v226_v44 = vld [vmem:[#allocation4 + $0x90] sm:$0xff]  ;;  %v1198_v46 = vpack.c.bf16 %v120_v41, %v119_v40  ;;  %v121_v49 = vld [vmem:[#allocation2 + $0x60] sm:$0xff]  ;;  %v122_v50 = vld [vmem:[#allocation2 + $0x68] sm:$0xff]  ;;  %v1222_v52 = vpack.c.bf16 %v236_v48, %v233_v47 }
  0x55   :  { %1190 = vmatpush3.bf16.msra.mxu0 %v1189_v14  ;;  %1213 = vmatpush1.bf16.msra.mxu1 %v1212_v31  ;;  %v1220_v51 = vpack.c.bf16 %v229_v45, %v226_v44  ;;  %v232_v53 = vld [vmem:[#allocation4 + $0xc0] sm:$0xff]  ;;  %v235_v54 = vld [vmem:[#allocation4 + $0xd8] sm:$0xff]  ;;  %v1201_v55 = vpack.c.bf16 %v122_v50, %v121_v49  ;;  %v242_v57 = vld [vmem:[#allocation4 + $0x110] sm:$0xff] }
  0x56   :  { %1191 = vmatprep.subr.bf16.mxu0 %v1458_v1  ;;  %1215 = vmatprep.subr.bf16.mxu1 %v1214_v34  ;;  %v239_v56 = vld [vmem:[#allocation4 + $0xf8] sm:$0xff]  ;;  %v123_v58 = vld [vmem:[#allocation2 + $0x70] sm:$0xff]  ;;  %v1224_v60 = vpack.c.bf16 %v235_v54, %v232_v53  ;;  %v241_v63 = vld [vmem:[#allocation4 + $0x108] sm:$0xff] }
  0x57   :  { %v124_v59 = vld [vmem:[#allocation2 + $0x78] sm:$0xff]  ;;  %v1226_v61 = vpack.c.bf16 %v242_v57, %v239_v56  ;;  %v238_v62 = vld [vmem:[#allocation4 + $0xf0] sm:$0xff]  ;;  %v245_v2 = vld [vmem:[#allocation4 + $0x128] sm:$0xff] }
  0x58   :  { %v1204_v0 = vpack.c.bf16 %v124_v59, %v123_v58  ;;  %v248_v3 = vld [vmem:[#allocation4 + $0x140] sm:$0xff]  ;;  %v1228_v4 = vpack.c.bf16 %v241_v63, %v238_v62  ;;  %v247_v7 = vld [vmem:[#allocation4 + $0x138] sm:$0xff]  ;;  %v254_v9 = vld [vmem:[#allocation4 + $0x170] sm:$0xff] }
  0x59   :  { %1193 = vmatpush3.bf16.msra.mxu0 %v1192_v22  ;;  %1217 = vmatpush1.bf16.msra.mxu1 %v1216_v42  ;;  %v1230_v5 = vpack.c.bf16 %v248_v3, %v245_v2  ;;  %v244_v6 = vld [vmem:[#allocation4 + $0x120] sm:$0xff]  ;;  %v251_v8 = vld [vmem:[#allocation4 + $0x158] sm:$0xff]  ;;  %v210_v14 = vld [vmem:[#allocation4 + $0x10] sm:$0xff] }
  0x5a   :  { %1194 = vmatprep.subr.bf16.mxu0 %v1458_v1  ;;  %1219 = vmatprep.subr.bf16.mxu1 %v1218_v43  ;;  %v1232_v11 = vpack.c.bf16 %v247_v7, %v244_v6  ;;  %v1234_v12 = vpack.c.bf16 %v254_v9, %v251_v8  ;;  %v213_v15 = vld [vmem:[#allocation4 + $0x28] sm:$0xff]  ;;  %v216_v19 = vld [vmem:[#allocation4 + $0x40] sm:$0xff]  ;;  %v219_v20 = vld [vmem:[#allocation4 + $0x58] sm:$0xff] }
  0x5b   :  { %v1239_v17 = vpack.c.bf16 %v213_v15, %v210_v14  ;;  %v1242_v22 = vpack.c.bf16 %v219_v20, %v216_v19  ;;  %v222_v25 = vld [vmem:[#allocation4 + $0x70] sm:$0xff]  ;;  %v225_v26 = vld [vmem:[#allocation4 + $0x88] sm:$0xff]  ;;  %v228_v28 = vld [vmem:[#allocation4 + $0xa0] sm:$0xff] }
  0x5c   :  { %v1245_v27 = vpack.c.bf16 %v225_v26, %v222_v25  ;;  %v231_v29 = vld [vmem:[#allocation4 + $0xb8] sm:$0xff]  ;;  %v234_v31 = vld [vmem:[#allocation4 + $0xd0] sm:$0xff]  ;;  %v237_v32 = vld [vmem:[#allocation4 + $0xe8] sm:$0xff] }
  0x5d   :  { %1196 = vmatpush3.bf16.msra.mxu0 %v1195_v37  ;;  %1221 = vmatpush1.bf16.msra.mxu1 %v1220_v51  ;;  %v1248_v30 = vpack.c.bf16 %v231_v29, %v228_v28  ;;  %v1251_v33 = vpack.c.bf16 %v237_v32, %v234_v31  ;;  %v240_v34 = vld [vmem:[#allocation4 + $0x100] sm:$0xff]  ;;  %v243_v35 = vld [vmem:[#allocation4 + $0x118] sm:$0xff]  ;;  %v246_v37 = vld [vmem:[#allocation4 + $0x130] sm:$0xff] }
  0x5e   :  { %1197 = vmatprep.subr.bf16.mxu0 %v1458_v1  ;;  %1223 = vmatprep.subr.bf16.mxu1 %v1222_v52  ;;  %v1254_v36 = vpack.c.bf16 %v243_v35, %v240_v34  ;;  %v249_v38 = vld [vmem:[#allocation4 + $0x148] sm:$0xff]  ;;  %v250_v40 = vld [vmem:[#allocation4 + $0x150] sm:$0xff]  ;;  %v252_v42 = vld [vmem:[#allocation4 + $0x160] sm:$0xff] }
  0x5f   :  { %v1257_v39 = vpack.c.bf16 %v249_v38, %v246_v37  ;;  %v253_v41 = vld [vmem:[#allocation4 + $0x168] sm:$0xff]  ;;  %v255_v44 = vld [vmem:[#allocation4 + $0x178] sm:$0xff]  ;;  %v127_v54 = vld [vmem:[%s1717_s2 + $0x10] sm:$0xff] }
  0x60   :  { %v1236_v43 = vpack.c.bf16 %v253_v41, %v250_v40  ;;  %v1260_v45 = vpack.c.bf16 %v255_v44, %v252_v42  ;;  %v126_v50 = vld [vmem:[%s1717_s2 + $0x8] sm:$0xff]  ;;  %v635_v44 = vld [vmem:[#allocation6] sm:$0xff] }
  0x61   :  { %1199 = vmatpush3.bf16.msra.mxu0 %v1198_v46  ;;  %1225 = vmatpush1.bf16.msra.mxu1 %v1224_v60  ;;  %v125_v46 = vld [vmem:[%s1717_s2] sm:$0xff] }
  0x62   :  { %1200 = vmatprep.subr.bf16.mxu0 %v1458_v1  ;;  %1227 = vmatprep.subr.bf16.mxu1 %v1226_v61 }
  0x65   :  { %1202 = vmatpush3.bf16.msra.mxu0 %v1201_v55  ;;  %1229 = vmatpush1.bf16.msra.mxu1 %v1228_v4 }
  0x66   :  { %1203 = vmatprep.subr.bf16.mxu0 %v1458_v1  ;;  %1231 = vmatprep.subr.bf16.mxu1 %v1230_v5 }
  0x69   :  { %1205 = vmatpush3.bf16.msra.mxu0 %v1204_v0  ;;  %1233 = vmatpush1.bf16.msra.mxu1 %v1232_v11 }
  0x6a   :  { %1238 = vmatprep.subr.bf16.mxu0 %v1458_v1  ;;  %1235 = vmatprep.subr.bf16.mxu1 %v1234_v12 }
  0x6d   :  { %1237 = vmatpush1.bf16.msra.mxu1 %v1236_v43 }
  0x6e   :  { %1262 = vmatprep.subr.bf16.mxu1 %v1458_v1 }
  0xca   :  { %v93_v18 = vpop.permute.xlu0 %92 }
  0xcb   :  { %vm100_vm1 = vcmp.eq.s32.totalorder %v1597_v16, %v93_v18  ;;  %v99_v24 = vpop.permute.xlu1 %98 }
  0xcc   :  { %1021 = vmatmul.mubr.msk.f32.vlgmr.msra.gmra.mrb[0].mxu0 %vm100_vm1, %v1461_v21  ;;  %vm102_vm3 = vcmp.eq.s32.totalorder %v1597_v16, %v99_v24 }
  0xcd   :  { %1023 = vmatprep.mubr.msk.f32.mxu0 %vm1459_vm0, %v1460_v10  ;;  %1240 = vmatpush3.bf16.msra.mxu0 %v1239_v17 }
  0xce   :  { %v96_v23 = vpop.permute.xlu0 %95  ;;  %1241 = vmatprep.subr.bf16.mxu0 %v1458_v1 }
  0xcf   :  { %vm101_vm2 = vcmp.eq.s32.totalorder %v1597_v16, %v96_v23 }
  0xd0   :  { %1024 = vmatmul.mubr.msk.f32.gmra.mrb[2].mxu0 %vm101_vm2, %v1461_v21 }
  0xd1   :  { %1026 = vmatprep.mubr.msk.f32.mxu0 %vm1459_vm0, %v1460_v10  ;;  %1243 = vmatpush3.bf16.msra.mxu0 %v1242_v22 }
  0xd2   :  { %1244 = vmatprep.subr.bf16.mxu0 %v1458_v1 }
  0xd4   :  { %1027 = vmatmul.mubr.msk.f32.gmra.mrb[4].mxu0 %vm102_vm3, %v1461_v21 }
  0xd5   :  { %1246 = vmatpush3.bf16.msra.mxu0 %v1245_v27  ;;  %1061 = vmatprep.mubr.msk.f32.mxu0 %vm1459_vm0, %v1460_v10 }
  0xd6   :  { %1247 = vmatprep.subr.bf16.mxu0 %v1458_v1 }
  0xd9   :  { %1249 = vmatpush3.bf16.msra.mxu0 %v1248_v30 }
  0xda   :  { %1250 = vmatprep.subr.bf16.mxu0 %v1458_v1 }
  0xdd   :  { %1252 = vmatpush3.bf16.msra.mxu0 %v1251_v33 }
  0xde   :  { %1253 = vmatprep.subr.bf16.mxu0 %v1458_v1 }
  0xe1   :  { %1255 = vmatpush3.bf16.msra.mxu0 %v1254_v36 }
  0xe2   :  { %1256 = vmatprep.subr.bf16.mxu0 %v1458_v1 }
  0xe5   :  { %1258 = vmatpush3.bf16.msra.mxu0 %v1257_v39 }
  0xe6   :  { %1259 = vmatprep.subr.bf16.mxu0 %v1458_v1 }
  0xe9   :  { %1261 = vmatpush3.bf16.msra.mxu0 %v1260_v45  ;;  %v636_v45 = vld [vmem:[#allocation6 + $0x8] sm:$0xff] }
  0xea   :  { %1292 = vmatprep.subr.bf16.mxu0 %v1458_v1 }
 0x19f   :  { %v194_v47 = vpop.f32.mrb[0].mxu0 }
 0x1a0   :  { %v195_v48 = vadd.f32 %v194_v47, %v125_v46  ;;  %v1022_v49 = vpop.f32.mrb[1].mxu0  ;;  %v1269_v47 = vpack.c.bf16 %v636_v45, %v635_v44  ;;  %v898_v45 = vld [vmem:[%s1720_s5] ss:$0 sm:$0xff] }
 0x1a1   :  { %v637_v49 = vld [vmem:[#allocation6 + $0x10] sm:$0xff] }
 0x1a2   :  { %321 = vmatmul.mubr.f32.vlgmr.msra.gmra.mrb[0].mxu1 %v195_v48  ;;  %1062 = vmatmul.mubr.f32.vlgmr.msra.gmra.mrb[6].mxu0 %v195_v48 }
 0x1a3   :  { %v199_v51 = vpop.f32.mrb[2].mxu0  ;;  %326 = vmatprep.mubr.f32.mxu1 %v1460_v10  ;;  %1064 = vmatprep.mubr.msk.f32.mxu0 %vm1459_vm0, %v1460_v10 }
 0x1a4   :  { %v200_v52 = vadd.f32 %v199_v51, %v126_v50  ;;  %v1025_v53 = vpop.f32.mrb[3].mxu0  ;;  %v638_v50 = vld [vmem:[#allocation6 + $0x18] sm:$0xff] }
 0x1a6   :  { %327 = vmatmul.mubr.f32.gmra.mrb[2].mxu1 %v200_v52  ;;  %1065 = vmatmul.mubr.f32.gmra.mrb[8].mxu0 %v200_v52  ;;  %v1272_v52 = vpack.c.bf16 %v638_v50, %v637_v49 }
 0x1a7   :  { %v204_v55 = vpop.f32.mrb[4].mxu0  ;;  %332 = vmatprep.mubr.f32.mxu1 %v1460_v10  ;;  %1067 = vmatprep.mubr.msk.f32.mxu0 %vm1459_vm0, %v1460_v10 }
 0x1a8   :  { %v205_v56 = vadd.f32 %v204_v55, %v127_v54  ;;  %v1028_v57 = vpop.f32.mrb[5].mxu0  ;;  %v639_v54 = vld [vmem:[#allocation6 + $0x20] sm:$0xff]  ;;  %v640_v55 = vld [vmem:[#allocation6 + $0x28] sm:$0xff] }
 0x1a9   :  { %v1275_v57 = vpack.c.bf16 %v640_v55, %v639_v54  ;;  %v899_v55 = vld [vmem:[%s1722_s7] ss:$0 sm:$0xff] }
 0x1aa   :  { %333 = vmatmul.mubr.f32.gmra.mrb[4].mxu1 %v205_v56  ;;  %1068 = vmatmul.mubr.f32.gmra.mrb[10].mxu0 %v205_v56 }
 0x1ab   :  { %1076 = vmatprep.mubr.msk.f32.mxu1 %vm1459_vm0, %v1460_v10  ;;  %1173 = vmatprep.mubr.msk.f32.mxu0 %vm1459_vm0, %v1460_v10 }
 0x275   :  { %v322_v58 = vpop.f32.mrb[0].mxu1  ;;  %v405_v59 = vpop.f32.mrb[6].mxu0 }
 0x276   :  { %v324_v60 = vpop.f32.mrb[1].mxu1  ;;  %v1063_v61 = vpop.f32.mrb[7].mxu0 }
 0x279   :  { %v328_v62 = vpop.f32.mrb[2].mxu1  ;;  %v410_v63 = vpop.f32.mrb[8].mxu0 }
 0x27a   :  { %v1266_v0 = vpack.c.bf16 %v410_v63, %v405_v59  ;;  %v330_v2 = vpop.f32.mrb[3].mxu1  ;;  %v1066_v3 = vpop.f32.mrb[9].mxu0  ;;  %v641_v59 = vld [vmem:[#allocation6 + $0x30] sm:$0xff]  ;;  %v644_v63 = vld [vmem:[#allocation6 + $0x48] sm:$0xff] }
 0x27b   :  { %v1263_v4 = vpack.c.bf16 %v330_v2, %v324_v60  ;;  %v642_v60 = vld [vmem:[#allocation6 + $0x38] sm:$0xff]  ;;  %v645_v2 = vld [vmem:[#allocation6 + $0x50] sm:$0xff] }
 0x27c   :  { %v1278_v61 = vpack.c.bf16 %v642_v60, %v641_v59  ;;  %v646_v3 = vld [vmem:[#allocation6 + $0x58] sm:$0xff] }
 0x27d   :  { %1264 = vmatpush3.bf16.xpose.msra.mxu1 %v1263_v4  ;;  %v334_v5 = vpop.f32.mrb[4].mxu1  ;;  %v415_v6 = vpop.f32.mrb[10].mxu0  ;;  %v1284_v4 = vpack.c.bf16 %v646_v3, %v645_v2 }
 0x27e   :  { %v336_v7 = vpop.f32.mrb[5].mxu1  ;;  %v1069_v8 = vpop.f32.mrb[11].mxu0  ;;  %1074 = vmatprep.subr.mxu1 %v1460_v10 }
 0x27f   :  { %v649_v8 = vld [vmem:[#allocation6 + $0x70] sm:$0xff] }
 0x285   :  { %1075 = vmatpush3.xpose.msra.mxu1 %v336_v7 }
 0x286   :  { %1265 = vmatprep.subr.bf16.mxu1 %v1458_v1 }
 0x288   :  { %1077 = vmatmul.mubr.f32.vlgmr.msra.gmra.mrb[6].mxu1 %v322_v58 }
 0x289   :  { %1267 = vmatpush3.bf16.msra.mxu1 %v1266_v0  ;;  %1079 = vmatprep.mubr.msk.f32.mxu1 %vm1459_vm0, %v1460_v10 }
 0x28a   :  { %1089 = vmatprep.subr.mxu1 %v1460_v10 }
 0x28c   :  { %1080 = vmatmul.mubr.f32.gmra.mrb[8].mxu1 %v328_v62  ;;  %v643_v62 = vld [vmem:[#allocation6 + $0x40] sm:$0xff] }
 0x28d   :  { %1090 = vmatpush3.msra.mxu1 %v415_v6  ;;  %1082 = vmatprep.mubr.msk.f32.mxu1 %vm1459_vm0, %v1460_v10  ;;  %v1281_v0 = vpack.c.bf16 %v644_v63, %v643_v62  ;;  %v648_v6 = vld [vmem:[#allocation6 + $0x68] sm:$0xff] }
 0x28e   :  { %1268 = vmatprep.subr.bf16.mxu1 %v1458_v1 }
 0x290   :  { %1083 = vmatmul.mubr.f32.gmra.mrb[10].mxu1 %v334_v5  ;;  %v647_v5 = vld [vmem:[#allocation6 + $0x60] sm:$0xff] }
 0x291   :  { %1091 = vmatprep.mubr.msk.f32.mxu1 %vm1459_vm0, %v1460_v10  ;;  %v1287_v7 = vpack.c.bf16 %v648_v6, %v647_v5 }
 0x35b   :  { %v485_v9 = vpop.f32.mrb[6].mxu1 }
 0x35c   :  { %v499_v11 = vmul.f32 0.17677669, %v485_v9  ;;  %v1078_v12 = vpop.f32.mrb[7].mxu1  ;;  %v650_v9 = vld [vmem:[#allocation6 + $0x78] sm:$0xff] }
 0x35d   :  { %v738_v12 = vld [vmem:[#allocation7] sm:$0xff] }
 0x35e   :  { %v503_v13 = vsel %vm502_vm4, %v499_v11, -1e+30  ;;  %v1290_v11 = vpack.c.bf16 %v650_v9, %v649_v8 }
 0x35f   :  { %v490_v14 = vpop.f32.mrb[8].mxu1  ;;  %v507_v15 = vsel %vm506_vm5, %v503_v13, -inf }
 0x360   :  { %v500_v17 = vmul.f32 0.17677669, %v490_v14  ;;  %508 = vmax.xlane.f32.xlu1 %v507_v15  ;;  %v1081_v18 = vpop.f32.mrb[9].mxu1  ;;  %v740_v14 = vld [vmem:[#allocation7 + $0x10] sm:$0xff] }
 0x362   :  { %v504_v19 = vsel %vm502_vm4, %v500_v17, -1e+30  ;;  %v741_v17 = vld [vmem:[#allocation7 + $0x18] sm:$0xff] }
 0x363   :  { %v495_v20 = vpop.f32.mrb[10].mxu1  ;;  %v510_v21 = vsel %vm506_vm5, %v504_v19, -inf  ;;  %v1296_v18 = vpack.c.bf16 %v741_v17, %v740_v14 }
 0x364   :  { %v501_v22 = vmul.f32 0.17677669, %v495_v20  ;;  %511 = vmax.xlane.f32.xlu0 %v510_v21  ;;  %v1084_v23 = vpop.f32.mrb[11].mxu1  ;;  %v743_v20 = vld [vmem:[#allocation7 + $0x28] sm:$0xff] }
 0x365   :  { %v745_v23 = vld [vmem:[#allocation7 + $0x38] sm:$0xff] }
 0x366   :  { %v505_v24 = vsel %vm502_vm4, %v501_v22, -1e+30  ;;  %v744_v22 = vld [vmem:[#allocation7 + $0x30] sm:$0xff] }
 0x367   :  { %v513_v25 = vsel %vm506_vm5, %v505_v24, -inf }
 0x368   :  { %514 = vmax.xlane.f32.xlu0 %v513_v25  ;;  %v746_v25 = vld [vmem:[#allocation7 + $0x40] sm:$0xff] }
 0x3ed   :  { %v509_v26 = vpop.xlane.xlu1 %508 }
 0x3ee   :  { %v516_v27 = vsub.f32 %v503_v13, %v509_v26  ;;  %v739_v13 = vld [vmem:[#allocation7 + $0x8] sm:$0xff] }
 0x3ef   :  { %v1293_v15 = vpack.c.bf16 %v739_v13, %v738_v12  ;;  %v747_v26 = vld [vmem:[#allocation7 + $0x48] sm:$0xff] }
 0x3f0   :  { %v519_v28 = vmul.f32 1.442695, %v516_v27  ;;  %v1305_v27 = vpack.c.bf16 %v747_v26, %v746_v25 }
 0x3f1   :  { %v512_v29 = vpop.xlane.xlu0 %511  ;;  %1294 = vmatpush3.bf16.msra.mxu0 %v1293_v15 }
 0x3f2   :  { %1331 = vpow2.f32 %v519_v28  ;;  %v517_v30 = vsub.f32 %v504_v19, %v512_v29  ;;  %1295 = vmatprep.subr.bf16.mxu0 %v1458_v1  ;;  %v742_v19 = vld [vmem:[#allocation7 + $0x20] sm:$0xff]  ;;  %v748_v28 = vld [vmem:[#allocation7 + $0x50] sm:$0xff]  ;;  %v749_v29 = vld [vmem:[#allocation7 + $0x58] sm:$0xff] }
 0x3f3   :  { %v1299_v21 = vpack.c.bf16 %v743_v20, %v742_v19 }
 0x3f4   :  { %v521_v31 = vmul.f32 1.442695, %v517_v30  ;;  %v1308_v30 = vpack.c.bf16 %v749_v29, %v748_v28 }
 0x3f5   :  { %v515_v32 = vpop.xlane.xlu0 %514  ;;  %1297 = vmatpush3.bf16.msra.mxu0 %v1296_v18 }
 0x3f6   :  { %1333 = vpow2.f32 %v521_v31  ;;  %v518_v33 = vsub.f32 %v505_v24, %v515_v32  ;;  %1298 = vmatprep.subr.bf16.mxu0 %v1458_v1  ;;  %v1302_v24 = vpack.c.bf16 %v745_v23, %v744_v22  ;;  %v750_v31 = vld [vmem:[#allocation7 + $0x60] sm:$0xff]  ;;  %v751_v32 = vld [vmem:[#allocation7 + $0x68] sm:$0xff] }
 0x3f8   :  { %v523_v34 = vmul.f32 1.442695, %v518_v33  ;;  %v1311_v33 = vpack.c.bf16 %v751_v32, %v750_v31 }
 0x3f9   :  { %1300 = vmatpush3.bf16.msra.mxu0 %v1299_v21 }
 0x3fa   :  { %1335 = vpow2.f32 %v523_v34  ;;  %1301 = vmatprep.subr.bf16.mxu0 %v1458_v1 }
 0x3fc   :  { %v1332_v35 = vpop.eup %1331 }
 0x3fd   :  { %v525_v36 = vsel %vm506_vm5, %v1332_v35, 0.0  ;;  %1303 = vmatpush3.bf16.msra.mxu0 %v1302_v24 }
 0x3fe   :  { %526 = vadd.xlane.f32.xlu1 %v525_v36  ;;  %1304 = vmatprep.subr.bf16.mxu0 %v1458_v1 }
 0x400   :  { %v1334_v37 = vpop.eup %1333 }
 0x401   :  { %v528_v38 = vsel %vm506_vm5, %v1334_v37, 0.0  ;;  %1306 = vmatpush3.bf16.msra.mxu0 %v1305_v27 }
 0x402   :  { %529 = vadd.xlane.f32.xlu0 %v528_v38  ;;  %1307 = vmatprep.subr.bf16.mxu0 %v1458_v1 }
 0x404   :  { %v1336_v39 = vpop.eup %1335 }
 0x405   :  { %v531_v40 = vsel %vm506_vm5, %v1336_v39, 0.0  ;;  %1309 = vmatpush3.bf16.msra.mxu0 %v1308_v30 }
 0x406   :  { %532 = vadd.xlane.f32.xlu1 %v531_v40  ;;  %1310 = vmatprep.subr.bf16.mxu0 %v1458_v1 }
 0x409   :  { %1312 = vmatpush3.bf16.msra.mxu0 %v1311_v33 }
 0x40a   :  { %1313 = vmatprep.subr.bf16.mxu0 %v1458_v1 }
 0x48b   :  { %v527_v41 = vpop.xlane.xlu1 %526 }
 0x48c   :  { %1337 = vrcp.f32 %v527_v41 }
 0x48f   :  { %v530_v42 = vpop.xlane.xlu0 %529 }
 0x490   :  { %1339 = vrcp.f32 %v530_v42  ;;  %v752_v42 = vld [vmem:[#allocation7 + $0x70] sm:$0xff] }
 0x493   :  { %v533_v43 = vpop.xlane.xlu1 %532 }
 0x494   :  { %1341 = vrcp.f32 %v533_v43  ;;  %v753_v43 = vld [vmem:[#allocation7 + $0x78] sm:$0xff] }
 0x495   :  { %v1314_v44 = vpack.c.bf16 %v753_v43, %v752_v42 }
 0x496   :  { %v1338_v46 = vpop.eup %1337 }
 0x497   :  { %v537_v48 = vmul.f32 %v1338_v46, %v1332_v35  ;;  %1315 = vmatpush3.bf16.msra.mxu0 %v1314_v44 }
 0x499   :  { %1092 = vmatmul.mubr.msk.f32.vlgmr.msra.gmra.mrb[12].mxu1 %vm506_vm5, %v537_v48 }
 0x49a   :  { %v1340_v51 = vpop.eup %1339  ;;  %1094 = vmatprep.mubr.msk.f32.mxu1 %vm1459_vm0, %v1460_v10  ;;  %1270 = vmatpush3.bf16.msra.mxu1 %v1269_v47 }
 0x49b   :  { %v538_v53 = vmul.f32 %v1340_v51, %v1334_v37  ;;  %1271 = vmatprep.subr.bf16.mxu1 %v1458_v1 }
 0x49d   :  { %1095 = vmatmul.mubr.msk.f32.gmra.mrb[14].mxu1 %vm506_vm5, %v538_v53 }
 0x49e   :  { %v1342_v56 = vpop.eup %1341  ;;  %1097 = vmatprep.mubr.msk.f32.mxu1 %vm1459_vm0, %v1460_v10  ;;  %1273 = vmatpush3.bf16.msra.mxu1 %v1272_v52 }
 0x49f   :  { %v539_v58 = vmul.f32 %v1342_v56, %v1336_v39  ;;  %1274 = vmatprep.subr.bf16.mxu1 %v1458_v1 }
 0x4a1   :  { %1098 = vmatmul.mubr.msk.f32.gmra.mrb[16].mxu1 %vm506_vm5, %v539_v58 }
 0x4a2   :  { %1276 = vmatpush3.bf16.msra.mxu1 %v1275_v57  ;;  %1132 = vmatprep.mubr.msk.f32.mxu1 %vm1459_vm0, %v1460_v10 }
 0x4a3   :  { %1277 = vmatprep.subr.bf16.mxu1 %v1458_v1 }
 0x4a6   :  { %1279 = vmatpush3.bf16.msra.mxu1 %v1278_v61 }
 0x4a7   :  { %1280 = vmatprep.subr.bf16.mxu1 %v1458_v1 }
 0x4aa   :  { %1282 = vmatpush3.bf16.msra.mxu1 %v1281_v0 }
 0x4ab   :  { %1283 = vmatprep.subr.bf16.mxu1 %v1458_v1 }
 0x4ae   :  { %1285 = vmatpush3.bf16.msra.mxu1 %v1284_v4 }
 0x4af   :  { %1286 = vmatprep.subr.bf16.mxu1 %v1458_v1 }
 0x4b2   :  { %1288 = vmatpush3.bf16.msra.mxu1 %v1287_v7 }
 0x4b3   :  { %1289 = vmatprep.subr.bf16.mxu1 %v1458_v1 }
 0x4b6   :  { %1291 = vmatpush3.bf16.msra.mxu1 %v1290_v11 }
 0x56c   :  { %v615_v34 = vpop.f32.mrb[12].mxu1 }
 0x56d   :  { %629 = vst [vmem:[%s1724_s9] sm:$0xff] %v615_v34  ;;  %v632_v35 = vmax.f32 %v615_v34, 0.0  ;;  %v1093_v36 = vpop.f32.mrb[13].mxu1 }
 0x56f   :  { %1133 = vmatmul.mubr.f32.vlgmr.msra.gmra.mrb[18].mxu1 %v632_v35 }
 0x570   :  { %v620_v37 = vpop.f32.mrb[14].mxu1  ;;  %1135 = vmatprep.mubr.msk.f32.mxu1 %vm1459_vm0, %v1460_v10 }
 0x571   :  { %630 = vst [vmem:[%s1724_s9 + $0x8] sm:$0xff] %v620_v37  ;;  %v633_v38 = vmax.f32 %v620_v37, 0.0  ;;  %v1096_v39 = vpop.f32.mrb[15].mxu1 }
 0x573   :  { %1136 = vmatmul.mubr.f32.gmra.mrb[20].mxu1 %v633_v38 }
 0x574   :  { %v625_v1 = vpop.f32.mrb[16].mxu1  ;;  %1138 = vmatprep.mubr.msk.f32.mxu1 %vm1459_vm0, %v1460_v10 }
 0x575   :  { %631 = vst [vmem:[%s1724_s9 + $0x10] sm:$0xff] %v625_v1  ;;  %v634_v40 = vmax.f32 %v625_v1, 0.0  ;;  %v1099_v41 = vpop.f32.mrb[17].mxu1 }
 0x577   :  { %1139 = vmatmul.mubr.f32.gmra.mrb[22].mxu1 %v634_v40 }
 0x642   :  { %v724_v46 = vpop.f32.mrb[18].mxu1 }
 0x643   :  { %v725_v47 = vadd.f32 %v898_v45, %v724_v46  ;;  %v1134_v48 = vpop.f32.mrb[19].mxu1 }
 0x645   :  { %1174 = vmatmul.mubr.f32.vlgmr.msra.gmra.mrb[12].mxu0 %v725_v47 }
 0x646   :  { %v729_v49 = vpop.f32.mrb[20].mxu1  ;;  %1176 = vmatprep.mubr.msk.f32.mxu0 %vm1459_vm0, %v1460_v10 }
 0x647   :  { %v730_v50 = vadd.f32 %v898_v45, %v729_v49  ;;  %v1137_v51 = vpop.f32.mrb[21].mxu1 }
 0x649   :  { %1177 = vmatmul.mubr.f32.gmra.mrb[14].mxu0 %v730_v50 }
 0x64a   :  { %v734_v52 = vpop.f32.mrb[22].mxu1  ;;  %1179 = vmatprep.mubr.msk.f32.mxu0 %vm1459_vm0, %v1460_v10 }
 0x64b   :  { %v735_v53 = vadd.f32 %v898_v45, %v734_v52  ;;  %v1140_v54 = vpop.f32.mrb[23].mxu1 }
 0x64d   :  { %1180 = vmatmul.mubr.f32.gmra.mrb[16].mxu0 %v735_v53 }
 0x718   :  { %v827_v56 = vpop.f32.mrb[12].mxu0 }
 0x719   :  { %v828_v57 = vadd.f32 %v899_v55, %v827_v56  ;;  %v1175_v58 = vpop.f32.mrb[13].mxu0 }
 0x71b   :  { %v842_v59 = vsel %vm841_vm6, %v828_v57, -1e+30 }
 0x71c   :  { %845 = vmax.xlane.f32.xlu0 %v842_v59  ;;  %v832_v60 = vpop.f32.mrb[14].mxu0 }
 0x71d   :  { %v833_v61 = vadd.f32 %v899_v55, %v832_v60  ;;  %v1178_v62 = vpop.f32.mrb[15].mxu0 }
 0x71f   :  { %v843_v63 = vsel %vm841_vm6, %v833_v61, -1e+30 }
 0x720   :  { %847 = vmax.xlane.f32.xlu1 %v843_v63  ;;  %v837_v10 = vpop.f32.mrb[16].mxu0 }
 0x721   :  { %v838_v0 = vadd.f32 %v899_v55, %v837_v10  ;;  %v1181_v2 = vpop.f32.mrb[17].mxu0 }
 0x723   :  { %v844_v3 = vsel %vm841_vm6, %v838_v0, -1e+30 }
 0x724   :  { %849 = vmax.xlane.f32.xlu0 %v844_v3 }
 0x7a9   :  { %v846_v4 = vpop.xlane.xlu0 %845 }
 0x7aa   :  { %v851_v5 = vsub.f32 %v842_v59, %v846_v4 }
 0x7ac   :  { %v854_v6 = vmul.f32 1.442695, %v851_v5 }
 0x7ad   :  { %v848_v7 = vpop.xlane.xlu1 %847 }
 0x7ae   :  { %1343 = vpow2.f32 %v854_v6  ;;  %v852_v16 = vsub.f32 %v843_v63, %v848_v7 }
 0x7b0   :  { %v856_v8 = vmul.f32 1.442695, %v852_v16 }
 0x7b1   :  { %v850_v9 = vpop.xlane.xlu0 %849 }
 0x7b2   :  { %1345 = vpow2.f32 %v856_v8  ;;  %v853_v11 = vsub.f32 %v844_v3, %v850_v9 }
 0x7b4   :  { %v858_v12 = vmul.f32 1.442695, %v853_v11 }
 0x7b6   :  { %1347 = vpow2.f32 %v858_v12 }
 0x7b8   :  { %v1344_v13 = vpop.eup %1343 }
 0x7b9   :  { %860 = vadd.xlane.f32.xlu1 %v1344_v13 }
 0x7bc   :  { %v1346_v14 = vpop.eup %1345 }
 0x7bd   :  { %862 = vadd.xlane.f32.xlu0 %v1346_v14 }
 0x7c0   :  { %v1348_v15 = vpop.eup %1347 }
 0x7c1   :  { %864 = vadd.xlane.f32.xlu1 %v1348_v15 }
 0x846   :  { %v861_v17 = vpop.xlane.xlu1 %860 }
 0x847   :  { %1349 = vlog2.f32 %v861_v17 }
 0x84a   :  { %v863_v18 = vpop.xlane.xlu0 %862 }
 0x84b   :  { %1351 = vlog2.f32 %v863_v18 }
 0x84e   :  { %v865_v19 = vpop.xlane.xlu1 %864 }
 0x84f   :  { %1353 = vlog2.f32 %v865_v19 }
 0x851   :  { %v1350_v20 = vpop.eup %1349 }
 0x852   :  { %v867_v21 = vmul.f32 0.6931472, %v1350_v20 }
 0x854   :  { %v872_v22 = vsub.f32 %v851_v5, %v867_v21 }
 0x855   :  { %v1352_v23 = vpop.eup %1351 }
 0x856   :  { %875 = vst [vmem:[%s1723_s8] sm:$0xff] %v872_v22  ;;  %v869_v24 = vmul.f32 0.6931472, %v1352_v23 }
 0x858   :  { %v873_v25 = vsub.f32 %v852_v16, %v869_v24 }
 0x859   :  { %v1354_v26 = vpop.eup %1353 }
 0x85a   :  { %876 = vst [vmem:[%s1723_s8 + $0x8] sm:$0xff] %v873_v25  ;;  %v871_v27 = vmul.f32 0.6931472, %v1354_v26 }
 0x85c   :  { %v874_v28 = vsub.f32 %v853_v11, %v871_v27 }
 0x85e   :  { %877 = vst [vmem:[%s1723_s8 + $0x10] sm:$0xff] %v874_v28 }
 0x85f   :  { %886 = vsyncpa [#allocation3], 1 }
 0x860   :  { %887 = vsyncpa [#allocation5], 1 }
 0x861   :  { %888 = vsyncpa [#allocation8], 1 }

</bundles_post_ra>
